<compile_context>
chip_gen: v6e
topology: v6e:2x2x1
jax: 0.10.0
libtpu: 0.0.40
codegen_flags: <defaults>
</compile_context>

<pallas_src>
import jax
import jax.numpy as jnp
from jax.experimental import pallas as pl
from jax.experimental.pallas import tpu as pltpu


def _actor_critic_kernel(x_ref, w1_ref, b1_ref, w2_ref, b2_ref, out_ref):
    x = x_ref[...]

    # ----- fused layer 1: [TB, n_states] @ [n_states, 2H] -> ReLU -----
    h = jnp.dot(x, w1_ref[...], preferred_element_type=jnp.float32) + b1_ref[...]
    h = jnp.maximum(h, 0.0)

    # ----- fused layer 2 (block-diagonal): [TB, 2H] @ [2H, 1 + A] -----
    # Column 0 is the critic value; columns 1..A are the actor logits.
    y = jnp.dot(h, w2_ref[...], preferred_element_type=jnp.float32) + b2_ref[...]

    # Numerically stable softmax over the logit columns only, via a lane mask
    # (no unaligned lane slicing / concatenation inside the kernel).
    col = jax.lax.broadcasted_iota(jnp.int32, y.shape, 1)
    is_logit = col >= 1
    masked = jnp.where(is_logit, y, -jnp.inf)       # value column excluded
    m = jnp.max(masked, axis=1, keepdims=True)      # max logit (finite)
    # exp of pre-masked values: value column -> exp(-inf) == 0 exactly, so a
    # large value estimate can never overflow into the softmax.
    e = jnp.exp(masked - m)
    denom = jnp.sum(e, axis=1, keepdims=True)
    # Exact divide: rows must sum to 1 to f32 precision for Categorical
    # sampling / log-probs (approx reciprocal was too loose).
    probs = e / denom

    # Single lane-dense store: col 0 keeps the value, cols 1.. the probs.
    out_ref[...] = jnp.where(is_logit, probs, y)


def fuse_params(params):
    """One-time fusion of the four Linear layers (hoisted out of the per-call
    path): W1=[S,2H], b1=[1,2H], block-diagonal W2=[2H,1+A], b2=[1,1+A]."""
    hidden = params["wc1"].shape[1]
    n_actions = params["wa2"].shape[1]
    w1 = jnp.concatenate([params["wc1"], params["wa1"]], axis=1)
    b1 = jnp.concatenate([params["bc1"], params["ba1"]], axis=1)
    w2 = jnp.zeros((2 * hidden, 1 + n_actions), jnp.float32)
    w2 = w2.at[:hidden, :1].set(params["wc2"])
    w2 = w2.at[hidden:, 1:].set(params["wa2"])
    b2 = jnp.concatenate([params["bc2"], params["ba2"]], axis=1)
    return dict(w1=w1, b1=b1, w2=w2, b2=b2)


def actor_critic_forward(x, fused, *, block_b=4096):
    """x: [B, n_states] float32, fused = fuse_params(params).
    Returns (probs [B, n_actions], value [B, 1])."""
    B, n_states = x.shape
    w1, b1, w2, b2 = fused["w1"], fused["b1"], fused["w2"], fused["b2"]
    two_h = w1.shape[1]
    n_out = w2.shape[1]

    # Batch tile: as large as block_b allows (amortizes per-grid-step
    # overhead), sublane-aligned, and with >= 2 grid steps when B is big
    # enough so v7x megacore sharding actually uses both TensorCores.
    tb = min(block_b, B)
    if B >= 16:
        tb = min(tb, -(-B // 2))
    tb = max(8, -(-tb // 8) * 8)          # round up to a multiple of 8
    num_blocks = -(-B // tb)              # cdiv; partial last block handled
                                          # by Pallas (no jnp.pad HBM copy)

    flops = 2 * B * (n_states * two_h + two_h * n_out)
    bytes_accessed = 4 * (B * (n_states + n_out)
                          + w1.size + b1.size + w2.size + b2.size)

    out = pl.pallas_call(
        _actor_critic_kernel,
        out_shape=jax.ShapeDtypeStruct((B, n_out), jnp.float32),
        grid=(num_blocks,),
        in_specs=[
            pl.BlockSpec((tb, n_states), lambda i: (i, 0)),
            pl.BlockSpec(w1.shape, lambda i: (0, 0)),
            pl.BlockSpec(b1.shape, lambda i: (0, 0)),
            pl.BlockSpec(w2.shape, lambda i: (0, 0)),
            pl.BlockSpec(b2.shape, lambda i: (0, 0)),
        ],
        out_specs=pl.BlockSpec((tb, n_out), lambda i: (i, 0)),
        compiler_params=pltpu.CompilerParams(
            dimension_semantics=("parallel",),   # megacore sharding on v7x
            vmem_limit_bytes=32 << 20,           # v5e scoped default is 16 MiB
        ),
        cost_estimate=pl.CostEstimate(
            flops=flops,
            transcendentals=B * n_out,
            bytes_accessed=bytes_accessed,
        ),
    )(x, w1, b1, w2, b2)

    value = out[:, :1]
    probs = out[:, 1:]
    return probs, value


def init_params(key, n_states, n_actions, hidden_dim):
    """Deterministic init mimicking torch.nn.Linear default (U[-1/sqrt(fan_in), +])."""
    def linear(key, fan_in, fan_out):
        kw, kb = jax.random.split(key)
        bound = 1.0 / jnp.sqrt(fan_in)
        # stored as [in, out] so the kernel does x @ W + b
        w = jax.random.uniform(kw, (fan_in, fan_out), jnp.float32, -bound, bound)
        b = jax.random.uniform(kb, (1, fan_out), jnp.float32, -bound, bound)
        return w, b

    k1, k2, k3, k4 = jax.random.split(key, 4)
    wc1, bc1 = linear(k1, n_states, hidden_dim)
    wc2, bc2 = linear(k2, hidden_dim, 1)
    wa1, ba1 = linear(k3, n_states, hidden_dim)
    wa2, ba2 = linear(k4, hidden_dim, n_actions)
    return dict(wc1=wc1, bc1=bc1, wc2=wc2, bc2=bc2,
                wa1=wa1, ba1=ba1, wa2=wa2, ba2=ba2)


if __name__ == "__main__":
    # Small, module-consistent shapes: a batch of states with n_states features.
    B, n_states, n_actions, hidden_dim = 8, 32, 4, 32

    key = jax.random.PRNGKey(0)
    kx, kp = jax.random.split(key)
    x = jax.random.normal(kx, (B, n_states), dtype=jnp.float32)
    params = init_params(kp, n_states, n_actions, hidden_dim)
    fused = fuse_params(params)           # hoisted out of the per-call path

    probs, value = actor_critic_forward(x, fused)
    jax.block_until_ready((probs, value))

    # Reference check in plain JAX against the ORIGINAL (unfused) parameters,
    # which also validates the layer-1/layer-2 fusion done in fuse_params().
    h_c = jnp.maximum(x @ params["wc1"] + params["bc1"], 0.0)
    value_ref = h_c @ params["wc2"] + params["bc2"]
    h_a = jnp.maximum(x @ params["wa1"] + params["ba1"], 0.0)
    logits_ref = h_a @ params["wa2"] + params["ba2"]
    probs_ref = jax.nn.softmax(logits_ref, axis=1)

    assert probs.shape == (B, n_actions) and value.shape == (B, 1)
    assert jnp.allclose(value, value_ref, atol=1e-4, rtol=1e-4)
    assert jnp.allclose(probs, probs_ref, atol=1e-4, rtol=1e-4)
    assert jnp.allclose(jnp.sum(probs, axis=1), 1.0, atol=1e-4)

    print("KERNEL_OK")
</pallas_src>

<mosaic_0001>
module attributes {stable_mosaic.version = 11 : i64} {
  func.func @_actor_critic_kernel(%arg0: i32, %arg1: memref<8x32xf32, #tpu.memory_space<vmem>>, %arg2: memref<32x64xf32, #tpu.memory_space<vmem>>, %arg3: memref<1x64xf32, #tpu.memory_space<vmem>>, %arg4: memref<64x5xf32, #tpu.memory_space<vmem>>, %arg5: memref<1x5xf32, #tpu.memory_space<vmem>>, %arg6: memref<8x5xf32, #tpu.memory_space<vmem>>) attributes {dimension_semantics = [#tpu.dimension_semantics<parallel>], iteration_bounds = array<i64: 1>, scalar_prefetch = 0 : i64, scratch_operands = 0 : i64, tpu.core_type = #tpu.core_type<tc>, window_params = [{transform_indices = @transform_0, window_bounds = array<i64: 8, 32>}, {pipeline_mode = #tpu.pipeline_mode<synchronous>, transform_indices = @transform_1, window_bounds = array<i64: 32, 64>}, {pipeline_mode = #tpu.pipeline_mode<synchronous>, transform_indices = @transform_2, window_bounds = array<i64: 1, 64>}, {pipeline_mode = #tpu.pipeline_mode<synchronous>, transform_indices = @transform_3, window_bounds = array<i64: 64, 5>}, {pipeline_mode = #tpu.pipeline_mode<synchronous>, transform_indices = @transform_4, window_bounds = array<i64: 1, 5>}, {transform_indices = @transform_5, window_bounds = array<i64: 8, 5>}]} {
    %c0 = arith.constant 0 : index
    %c0_0 = arith.constant 0 : index
    %0 = vector.load %arg1[%c0, %c0_0] : memref<8x32xf32, #tpu.memory_space<vmem>>, vector<8x32xf32>
    %c0_1 = arith.constant 0 : index
    %c0_2 = arith.constant 0 : index
    %1 = vector.load %arg2[%c0_1, %c0_2] : memref<32x64xf32, #tpu.memory_space<vmem>>, vector<32x64xf32>
    %cst = arith.constant dense<0.000000e+00> : vector<8x64xf32>
    %2 = tpu.matmul %0, %1, %cst {dimension_numbers = #tpu.dot_dimension_numbers<[1], [0], [0], [1], [0, 0, 1, 1], [], []>} : vector<8x32xf32>, vector<32x64xf32>, vector<8x64xf32> -> vector<8x64xf32>
    %c0_3 = arith.constant 0 : index
    %c0_4 = arith.constant 0 : index
    %3 = vector.load %arg3[%c0_3, %c0_4] : memref<1x64xf32, #tpu.memory_space<vmem>>, vector<1x64xf32>
    %4 = vector.broadcast %3 : vector<1x64xf32> to vector<8x64xf32>
    %5 = arith.addf %2, %4 : vector<8x64xf32>
    %cst_5 = arith.constant 0.000000e+00 : f32
    %6 = vector.broadcast %cst_5 : f32 to vector<8x64xf32>
    %7 = arith.maximumf %5, %6 : vector<8x64xf32>
    %c0_6 = arith.constant 0 : index
    %c0_7 = arith.constant 0 : index
    %8 = vector.load %arg4[%c0_6, %c0_7] : memref<64x5xf32, #tpu.memory_space<vmem>>, vector<64x5xf32>
    %cst_8 = arith.constant dense<0.000000e+00> : vector<8x5xf32>
    %9 = tpu.matmul %7, %8, %cst_8 {dimension_numbers = #tpu.dot_dimension_numbers<[1], [0], [0], [1], [0, 0, 1, 1], [], []>} : vector<8x64xf32>, vector<64x5xf32>, vector<8x5xf32> -> vector<8x5xf32>
    %c0_9 = arith.constant 0 : index
    %c0_10 = arith.constant 0 : index
    %10 = vector.load %arg5[%c0_9, %c0_10] : memref<1x5xf32, #tpu.memory_space<vmem>>, vector<1x5xf32>
    %11 = vector.broadcast %10 : vector<1x5xf32> to vector<8x5xf32>
    %12 = arith.addf %9, %11 : vector<8x5xf32>
    %13 = tpu.iota {dimensions = array<i32: 1>} : vector<8x5xi32>
    %c1_i32 = arith.constant 1 : i32
    %14 = vector.broadcast %c1_i32 : i32 to vector<8x5xi32>
    %15 = arith.cmpi sge, %13, %14 : vector<8x5xi32>
    %cst_11 = arith.constant 0xFF800000 : f32
    %16 = vector.broadcast %cst_11 : f32 to vector<8x5xf32>
    %17 = arith.select %15, %12, %16 : vector<8x5xi1>, vector<8x5xf32>
    %cst_12 = arith.constant dense<0xFF800000> : vector<8xf32>
    %18 = vector.multi_reduction <maximumf>, %17, %cst_12 [1] : vector<8x5xf32> to vector<8xf32>
    %19 = vector.shape_cast %18 : vector<8xf32> to vector<8x1xf32>
    %20 = vector.broadcast %19 : vector<8x1xf32> to vector<8x5xf32>
    %21 = arith.subf %17, %20 : vector<8x5xf32>
    %22 = math.exp %21 : vector<8x5xf32>
    %cst_13 = arith.constant dense<0.000000e+00> : vector<8xf32>
    %23 = vector.multi_reduction <add>, %22, %cst_13 [1] : vector<8x5xf32> to vector<8xf32>
    %24 = vector.shape_cast %23 : vector<8xf32> to vector<8x1xf32>
    %25 = vector.broadcast %24 : vector<8x1xf32> to vector<8x5xf32>
    %26 = arith.divf %22, %25 : vector<8x5xf32>
    %27 = arith.select %15, %26, %12 : vector<8x5xi1>, vector<8x5xf32>
    %c0_14 = arith.constant 0 : index
    %c0_15 = arith.constant 0 : index
    %28 = vector.load %arg6[%c0_14, %c0_15] : memref<8x5xf32, #tpu.memory_space<vmem>>, vector<8x5xf32>
    tpu.vector_store %arg6[%c0_14, %c0_15], %27 {strides = array<i32>} : memref<8x5xf32, #tpu.memory_space<vmem>>, vector<8x5xf32>,
    return
  }
  func.func @transform_0(%arg0: i32) -> (i32, i32) {
    %c0_i32 = arith.constant 0 : i32
    %c0_i32_0 = arith.constant 0 : i32
    return %arg0, %c0_i32 : i32, i32
  }
  func.func @transform_1(%arg0: i32) -> (i32, i32) {
    %c0_i32 = arith.constant 0 : i32
    %c0_i32_0 = arith.constant 0 : i32
    %c0_i32_1 = arith.constant 0 : i32
    return %c0_i32, %c0_i32_0 : i32, i32
  }
  func.func @transform_2(%arg0: i32) -> (i32, i32) {
    %c0_i32 = arith.constant 0 : i32
    %c0_i32_0 = arith.constant 0 : i32
    %c0_i32_1 = arith.constant 0 : i32
    return %c0_i32, %c0_i32_0 : i32, i32
  }
  func.func @transform_3(%arg0: i32) -> (i32, i32) {
    %c0_i32 = arith.constant 0 : i32
    %c0_i32_0 = arith.constant 0 : i32
    %c0_i32_1 = arith.constant 0 : i32
    return %c0_i32, %c0_i32_0 : i32, i32
  }
  func.func @transform_4(%arg0: i32) -> (i32, i32) {
    %c0_i32 = arith.constant 0 : i32
    %c0_i32_0 = arith.constant 0 : i32
    %c0_i32_1 = arith.constant 0 : i32
    return %c0_i32, %c0_i32_0 : i32, i32
  }
  func.func @transform_5(%arg0: i32) -> (i32, i32) {
    %c0_i32 = arith.constant 0 : i32
    %c0_i32_0 = arith.constant 0 : i32
    return %arg0, %c0_i32 : i32, i32
  }
}

</mosaic_0001>

<bundles_post_ra>
// kernel: tpu_custom_call.1
= control target key start
LH: loop header
LB: loop body
LE: loop exit
PB: predicated region body
PF: predicated region fallthrough
CT: control target
= control target key end

     0   :  { %v306_v1 = vmov 0.0   ;;  %vm307_vm0 = vmmov 0   ;;  %s394_s0 = inlined_call_operand.vmem [shape: f32[8,32], index: 0, kind: input, shape index: {}]   ;;  %s395_s1 = inlined_call_operand.vmem [shape: f32[32,64], index: 1, kind: input, shape index: {}]   ;;  %s396_s2 = inlined_call_operand.vmem [shape: f32[1,64], index: 2, kind: input, shape index: {}]   ;;  %s397_s3 = inlined_call_operand.vmem [shape: f32[64,5], index: 3, kind: input, shape index: {}]   ;;  %s398_s4 = inlined_call_operand.vmem [shape: f32[1,5], index: 4, kind: input, shape index: {}]   ;;  %s399_s5 = inlined_call_operand.hbm [shape: f32[8,5], index: 5, kind: output, shape index: {}]  }
   0x1   :  { %v25_v0 = vld [vmem:[%s395_s1 + $0x18] sm:$0xff]  ;;  %247 = vmatprep.subr.mxu0 %v306_v1  ;;  %v24_v2 = vld [vmem:[%s395_s1 + $0x10] sm:$0xff]  ;;  %255 = vmatprep.mubr.msk.f32.mxu0 %vm307_vm0, %v306_v1  ;;  %v23_v5 = vld [vmem:[%s395_s1 + $0x8] sm:$0xff] }
   0x2   :  { %v115_v3 = vld [vmem:[%s397_s3 + $0x38] sm:$0xff]  ;;  %248 = vmatpush3.msra.mxu0 %v25_v0  ;;  %258 = vmatprep.subr.mxu1 %v306_v1  ;;  %v114_v4 = vld [vmem:[%s397_s3 + $0x30] sm:$0xff] }
   0x3   :  { %249 = vmatprep.subr.mxu0 %v306_v1  ;;  %259 = vmatpush3.msra.mxu1 %v115_v3 }
   0x4   :  { %10 = vsyncpa [#allocation3], 0  ;;  %250 = vmatpush3.msra.mxu0 %v24_v2  ;;  %260 = vmatprep.subr.mxu1 %v306_v1  ;;  %v113_v6 = vld [vmem:[%s397_s3 + $0x28] sm:$0xff]  ;;  %v22_v7 = vld [vmem:[%s395_s1] sm:$0xff]  ;;  %vm33_vm1 = vcmask 261120   ;;  %vm123_vm2 = vcmask 523264   ;;  %v197_v19 = vlaneseq }
   0x5   :  { %251 = vmatprep.subr.mxu0 %v306_v1  ;;  %261 = vmatpush3.msra.mxu1 %v114_v4  ;;  %v21_v8 = vld [vmem:[%s394_s0] sm:$0xff]  ;;  %v111_v10 = vld [vmem:[%s397_s3 + $0x18] sm:$0xff]  ;;  %v110_v11 = vld [vmem:[%s397_s3 + $0x10] sm:$0xff]  ;;  %vm201_vm4 = vcmask 39936  }
   0x6   :  { %252 = vmatpush3.msra.mxu0 %v23_v5  ;;  %262 = vmatprep.subr.mxu1 %v306_v1  ;;  %v112_v9 = vld [vmem:[%s397_s3 + $0x20] sm:$0xff]  ;;  %v109_v12 = vld [vmem:[%s397_s3 + $0x8] sm:$0xff]  ;;  %v198_v20 = vand.u32 127, %v197_v19 }
   0x7   :  { %253 = vmatprep.subr.mxu0 %v306_v1  ;;  %263 = vmatpush3.msra.mxu1 %v113_v6  ;;  %v108_v13 = vld [vmem:[%s397_s3] sm:$0xff] }
   0x8   :  { %254 = vmatpush3.msra.mxu0 %v22_v7  ;;  %264 = vmatprep.subr.mxu1 %v306_v1  ;;  %v229_v14 = vld [vmem:[%s396_s2] ss:$0 sm:$0xff]  ;;  %vm199_vm3 = vcmp.ge.s32.totalorder %v198_v20, 1  ;;  %s308_s2 = smov [#allocation2]  }
   0x9   :  { %256 = vmatmul.mubr.msk.f32.vlgmr.msra.gmra.mxu0 %vm33_vm1, %v21_v8  ;;  %265 = vmatpush3.msra.mxu1 %v112_v9  ;;  %v231_v21 = vld [vmem:[%s398_s4] ss:$0 sm:$0xff]  ;;  %s221_s3 = sshll.u32 %s308_s2, 4  ;;  %s222_s3 = int_to_ptr.vmem [resolvable:$true] %s221_s3 }
   0xa   :  { %266 = vmatprep.subr.mxu1 %v306_v1  ;;  %274 = vmatprep.mubr.msk.f32.mxu1 %vm307_vm0, %v306_v1  ;;  %s284_s4 = scalar_lea.vmem %s222_s3, 128  ;;  %p289_p1 = scmp.lt.s32.totalorder %s222_s3, %s222_s3 }
   0xb   :  { %267 = vmatpush3.msra.mxu1 %v111_v10  ;;  %p285_p0 = scmp.ne.s32.totalorder %s222_s3, %s284_s4  ;;  %p290_p2 = scmp.lt.s32.totalorder %s284_s4, %s284_s4 }
   0xc   :  { %268 = vmatprep.subr.mxu1 %v306_v1 }
   0xd   :  { %269 = vmatpush3.msra.mxu1 %v110_v11  ;;  %p291_p3 = por %p290_p2, %p289_p1 }
   0xe   :  { %270 = vmatprep.subr.mxu1 %v306_v1 }
   0xf   :  { %271 = vmatpush3.msra.mxu1 %v109_v12  ;;  %p292_p4 = pnand %p291_p3, %p285_p0 }
  0x10   :  { %272 = vmatprep.subr.mxu1 %v306_v1 }
  0x11   :  { %273 = vmatpush3.msra.mxu1 %v108_v13 }
  0xc9   :  { %v103_v15 = vpop.f32.mrf.mxu0 }
  0xca   :  { %v104_v16 = vadd.f32 %v229_v14, %v103_v15 }
  0xcb   :  { %v257_v17 = vpop.f32.mrf.mxu0 }
  0xcc   :  { %v107_v18 = vmax.f32 %v104_v16, 0.0 }
  0xce   :  { %275 = vmatmul.mubr.msk.f32.vlgmr.msra.gmra.mxu1 %vm123_vm2, %v107_v18 }
 0x18e   :  { %v193_v22 = vpop.f32.mrf.mxu1 }
 0x18f   :  { %v194_v23 = vadd.f32 %v231_v21, %v193_v22 }
 0x190   :  { %v276_v24 = vpop.f32.mrf.mxu1 }
 0x191   :  { %v200_v25 = vsel %vm199_vm3, %v194_v23, -inf }
 0x192   :  { %v202_v26 = vsel %vm201_vm4, %v200_v25, -inf }
 0x193   :  { %203 = vmax.xlane.f32.xlu0 %v202_v26 }
 0x21c   :  { %v204_v27 = vpop.xlane.xlu0 %203 }
 0x21d   :  { %v205_v28 = vsub.f32 %v200_v25, %v204_v27 }
 0x21f   :  { %v206_v29 = vmul.f32 1.442695, %v205_v28 }
 0x221   :  { %280 = vpow2.f32 %v206_v29 }
 0x22e   :  { %v281_v30 = vpop.eup %280 }
 0x22f   :  { %v208_v31 = vsel %vm201_vm4, %v281_v30, 0.0 }
 0x230   :  { %209 = vadd.xlane.f32.xlu0 %v208_v31 }
 0x2b9   :  { %v210_v32 = vpop.xlane.xlu0 %209 }
 0x2ba   :  { %282 = vrcp.f32 %v210_v32 }
 0x2c7   :  { %v283_v33 = vpop.eup %282 }
 0x2c8   :  { %v212_v34 = vmul.f32 %v283_v33, %v281_v30 }
 0x2ca   :  { %v213_v35 = vsel %vm199_vm3, %v212_v34, %v194_v23 }
 0x2cb   :  { %214 = vst.msk [vmem:[#allocation2] sm:$0xff] %vm201_vm4, %v213_v35 }
 0x2cc   :  { %295 = shalt.err (!%p292_p4)
}
 0x2cd   :  { %224 = dma.vmem_to_hbm [thread:$0]  %s222_s3, 128, %s399_s5, [#allocation3]  }
 0x2ce   :  { %304 = dma.done.wait [#allocation3], 128  }
 0x2cf   :  { %305 = vsyncadd [#allocation3], 4294967168 }
 0x2d0   :  { %228 = vsyncpa [#allocation3], 1 }

</bundles_post_ra>
